<compile_context>
chip_gen: v6e
topology: v6e:2x2x1
jax: 0.10.0
libtpu: 0.0.40
codegen_flags: <defaults>
</compile_context>

<pallas_src>
import functools

import jax
import jax.numpy as jnp
from jax.experimental import pallas as pl
from jax.experimental.pallas import tpu as pltpu


def _shortcut_kernel(x_ref, sel_ref, o_ref, *, pad, C):
    """One batch-block per grid step.

    x_ref:   (B*C, H*W)        flattened input images (lane dim = H*W)
    sel_ref: (H*W, Ho*Wo)      one-hot spatial-subsample matrix (resident)
    o_ref:   (B, Cout, Ho*Wo)  flattened output (lane dim = Ho*Wo)
    """
    B, Cout, HoWo = o_ref.shape

    # Stride-2 H and W subsample in one MXU matmul.  A one-hot selection in
    # f32 is numerically exact (each output element is x * 1.0 plus zeros).
    ds = jnp.dot(x_ref[...], sel_ref[...],
                 preferred_element_type=jnp.float32)          # (B*C, Ho*Wo)

    # Split B*C back out.  Free view when C % 8 == 0 (true for ResNet
    # option-A usage: C in {16, 32}); otherwise a relayout, still correct.
    data = ds.reshape(B, C, HoWo).astype(o_ref.dtype)

    # Zero only the two channel-pad slabs; write the data slab exactly once.
    if pad > 0:
        zeros = jnp.zeros((B, pad, HoWo), dtype=o_ref.dtype)
        o_ref[:, pl.ds(0, pad), :] = zeros
        o_ref[:, pl.ds(pad + C, pad), :] = zeros
    o_ref[:, pl.ds(pad, C), :] = data


def _pick_batch_block(N, C, per_image_bytes, target_bytes=2 << 20):
    """Largest divisor B of N giving ~target-sized input blocks, preferring
    >= 2 grid steps (megacore sharding) and (B*C) % 8 == 0 (sublane-aligned
    input block)."""
    divisors = [b for b in range(1, N + 1) if N % b == 0]
    ok = [b for b in divisors if (b * C) % 8 == 0 or b == N]
    fitting = [b for b in ok if b * per_image_bytes <= target_bytes]
    if not fitting:
        return min(ok)
    multi = [b for b in fitting if N // b >= 2]
    return max(multi) if multi else max(fitting)


def lambda_layer_option_a(x, planes):
    """== F.pad(x[:, :, ::2, ::2], (0,0,0,0, planes//4, planes//4), 'constant', 0)."""
    N, C, H, W = x.shape
    pad = planes // 4
    Ho, Wo = (H + 1) // 2, (W + 1) // 2        # matches PyTorch ::2 for odd dims too
    Cout = C + 2 * pad
    HW, HoWo = H * W, Ho * Wo
    itemsize = jnp.dtype(x.dtype).itemsize

    # One-hot spatial-subsample selection matrix, built once wrapper-side:
    # sel[i, j] = 1  iff  flattened input index i == 2*(j//Wo)*W + 2*(j%Wo).
    j = jnp.arange(HoWo)
    src = 2 * (j // Wo) * W + 2 * (j % Wo)
    sel = (jnp.arange(HW)[:, None] == src[None, :]).astype(x.dtype)    # (HW, HoWo)

    # Lane-dense flattened views (free reshapes of contiguous NCHW in HBM).
    x2 = x.reshape(N * C, HW)

    B = _pick_batch_block(N, C, C * HW * itemsize)
    grid = (N // B,)

    kernel = functools.partial(_shortcut_kernel, pad=pad, C=C)

    cost = pl.CostEstimate(
        flops=2 * N * C * HW * HoWo,
        transcendentals=0,
        bytes_accessed=(N * C * HW + N * Cout * HoWo + HW * HoWo) * itemsize,
    )

    out_flat = pl.pallas_call(
        kernel,
        out_shape=jax.ShapeDtypeStruct((N, Cout, HoWo), x.dtype),
        grid=grid,
        in_specs=[
            pl.BlockSpec((B * C, HW), lambda n: (n, 0)),
            pl.BlockSpec((HW, HoWo), lambda n: (0, 0)),   # resident; no re-DMA
        ],
        out_specs=pl.BlockSpec((B, Cout, HoWo), lambda n: (n, 0, 0)),
        compiler_params=pltpu.CompilerParams(
            dimension_semantics=("parallel",),
        ),
        cost_estimate=cost,
    )(x2, sel)

    return out_flat.reshape(N, Cout, Ho, Wo)


if __name__ == "__main__":
    key = jax.random.PRNGKey(0)
    # Small shapes consistent with ResNet option-A usage (layer-transition
    # shortcut): 16 input channels, planes=32 -> pad 8 per side, stride-2.
    N, C, H, W = 4, 16, 16, 16
    planes = 32

    x = jax.random.normal(key, (N, C, H, W), dtype=jnp.float32)

    out = jax.block_until_ready(lambda_layer_option_a(x, planes))

    # Pure-JAX reference of the PyTorch lambda's semantics.
    pad = planes // 4
    ref = jnp.pad(x[:, :, ::2, ::2], ((0, 0), (pad, pad), (0, 0), (0, 0)))

    assert out.shape == ref.shape, (out.shape, ref.shape)
    assert jnp.allclose(out, ref, atol=1e-6), "mismatch vs reference"

    print("KERNEL_OK")
</pallas_src>

<mosaic_0001>
module attributes {stable_mosaic.version = 11 : i64} {
  func.func @_shortcut_kernel(%arg0: i32, %arg1: memref<32x256xf32, #tpu.memory_space<vmem>>, %arg2: memref<256x64xf32, #tpu.memory_space<vmem>>, %arg3: memref<2x32x64xf32, #tpu.memory_space<vmem>>) attributes {dimension_semantics = [#tpu.dimension_semantics<parallel>], iteration_bounds = array<i64: 2>, scalar_prefetch = 0 : i64, scratch_operands = 0 : i64, tpu.core_type = #tpu.core_type<tc>, window_params = [{transform_indices = @transform_0, window_bounds = array<i64: 32, 256>}, {pipeline_mode = #tpu.pipeline_mode<synchronous>, transform_indices = @transform_1, window_bounds = array<i64: 256, 64>}, {transform_indices = @transform_2, window_bounds = array<i64: 2, 32, 64>}]} {
    %c0 = arith.constant 0 : index
    %c0_0 = arith.constant 0 : index
    %0 = vector.load %arg1[%c0, %c0_0] : memref<32x256xf32, #tpu.memory_space<vmem>>, vector<32x256xf32>
    %c0_1 = arith.constant 0 : index
    %c0_2 = arith.constant 0 : index
    %1 = vector.load %arg2[%c0_1, %c0_2] : memref<256x64xf32, #tpu.memory_space<vmem>>, vector<256x64xf32>
    %cst = arith.constant dense<0.000000e+00> : vector<32x64xf32>
    %2 = tpu.matmul %0, %1, %cst {dimension_numbers = #tpu.dot_dimension_numbers<[1], [0], [0], [1], [0, 0, 1, 1], [], []>} : vector<32x256xf32>, vector<256x64xf32>, vector<32x64xf32> -> vector<32x64xf32>
    %3 = vector.shape_cast %2 : vector<32x64xf32> to vector<2x16x64xf32>
    %cst_3 = arith.constant 0.000000e+00 : f32
    %4 = vector.broadcast %cst_3 : f32 to vector<2x8x64xf32>
    %c0_4 = arith.constant 0 : index
    %c0_5 = arith.constant 0 : index
    %c0_6 = arith.constant 0 : index
    %5 = vector.load %arg3[%c0_4, %c0_5, %c0_6] : memref<2x32x64xf32, #tpu.memory_space<vmem>>, vector<2x8x64xf32>
    tpu.vector_store %arg3[%c0_4, %c0_5, %c0_6], %4 {strides = array<i32>} : memref<2x32x64xf32, #tpu.memory_space<vmem>>, vector<2x8x64xf32>,
    %c0_7 = arith.constant 0 : index
    %c24 = arith.constant 24 : index
    %c0_8 = arith.constant 0 : index
    %6 = vector.load %arg3[%c0_7, %c24, %c0_8] : memref<2x32x64xf32, #tpu.memory_space<vmem>>, vector<2x8x64xf32>
    tpu.vector_store %arg3[%c0_7, %c24, %c0_8], %4 {strides = array<i32>} : memref<2x32x64xf32, #tpu.memory_space<vmem>>, vector<2x8x64xf32>,
    %c0_9 = arith.constant 0 : index
    %c8 = arith.constant 8 : index
    %c0_10 = arith.constant 0 : index
    %7 = vector.load %arg3[%c0_9, %c8, %c0_10] : memref<2x32x64xf32, #tpu.memory_space<vmem>>, vector<2x16x64xf32>
    tpu.vector_store %arg3[%c0_9, %c8, %c0_10], %3 {strides = array<i32>} : memref<2x32x64xf32, #tpu.memory_space<vmem>>, vector<2x16x64xf32>,
    return
  }
  func.func @transform_0(%arg0: i32) -> (i32, i32) {
    %c0_i32 = arith.constant 0 : i32
    %c0_i32_0 = arith.constant 0 : i32
    return %arg0, %c0_i32 : i32, i32
  }
  func.func @transform_1(%arg0: i32) -> (i32, i32) {
    %c0_i32 = arith.constant 0 : i32
    %c0_i32_0 = arith.constant 0 : i32
    %c0_i32_1 = arith.constant 0 : i32
    return %c0_i32, %c0_i32_0 : i32, i32
  }
  func.func @transform_2(%arg0: i32) -> (i32, i32, i32) {
    %c0_i32 = arith.constant 0 : i32
    %c0_i32_0 = arith.constant 0 : i32
    %c0_i32_1 = arith.constant 0 : i32
    return %arg0, %c0_i32, %c0_i32_0 : i32, i32, i32
  }
}

</mosaic_0001>

<bundles_post_ra>
// kernel: tpu_custom_call.1
= control target key start
LH: loop header
LB: loop body
LE: loop exit
PB: predicated region body
PF: predicated region fallthrough
CT: control target
= control target key end

     0   :  { %7 = vsyncpa [#allocation3], 0  ;;  %s780_s0 = inlined_call_operand.vmem [shape: f32[64,256], index: 0, kind: input, shape index: {}]   ;;  %s781_s1 = inlined_call_operand.vmem [shape: f32[256,64], index: 1, kind: input, shape index: {}]   ;;  %s782_s2 = inlined_call_operand.hbm [shape: f32[4,32,64], index: 2, kind: output, shape index: {}]  }
   0x1   :  { %9 = vsyncpa [#allocation3 + $0x1], 0  ;;  %s575_s9 = smov 0   ;;  %s577_s10 = smov 0  }
   0x2   :  { %s579_s11 = smov 0   ;;  %s581_s12 = smov 0  }
   0x3 LB: > { %s596_s13 = sadd.s32 4294967295, %s554_s12   ;;  %s359_s14 = sadd.s32 4294967294, %s554_s12   ;;  %s554_s12 = sphi %s581_s12, %s788_s12   ;;  %s550_s11 = sphi %s579_s11, %s787_s11   ;;  %s546_s10 = sphi %s577_s10, %s786_s10   ;;  %s542_s9 = sphi %s575_s9, %s785_s9  }
   0x4   : > { %s600_s15 = sadd.s32 1, %s554_s12   ;;  %s69_s16 = sadd.s32 1, %s550_s11 }
   0x5   : > { %s66_s17 = ssub.s32 %s554_s12, %s600_s15  ;;  %p79_p0 = scmp.ne.s32.totalorder %s550_s11, %s546_s10 }
   0x6   : > { %p67_p1 = scmp.eq.s32.totalorder %s66_s17, 0  ;;  %p80_p2 = scmp.eq.s32.totalorder %s596_s13, 1 }
   0x7   : > { %p85_p3 = scmp.ne.s32.totalorder %s546_s10, %s542_s9  ;;  %p86_p4 = scmp.eq.s32.totalorder %s359_s14, 1 }
   0x8   : > { %s611_s18 = scalar_select %p67_p1, %s550_s11, %s69_s16  }
   0x9   : > { %p613_p5 = por %p80_p2, %p79_p0  ;;  %p617_p6 = por %p86_p4, %p85_p3 }
   0xa   : > { %p362_p7 = scmp.ge.s32.totalorder %s554_s12, 1  ;;  %p117_p8 = scmp.lt.s32.totalorder %s554_s12, 3 }
   0xc   : > { %p118_p9 = pnand %p362_p7, %p117_p8 }
   0xd   : > { %s364_s6 = sshll.u32 (!%p118_p9), %s596_s13, 2  ;;  %s137_s5 = sand.u32 (!%p118_p9), 1, %s546_s10  }
   0xe   : > { %121 = sbr.rel (%p118_p9) target bundleno = 268 (0x10c), region = 28  ;;  %p141_p10 = scmp.lt.s32.totalorder (!%p118_p9), %s364_s6, 7 }
   0xf   : > { %s363_s7 = sshll.u32 (!%p118_p9), %s137_s5, 6  ;;  %s375_s14 = sshll.u32 (!%p118_p9), %s596_s13, 10 }
  0x10   : > { %s139_s8 = scalar_lea.vmem (!%p118_p9), [#allocation2], %s363_s7  ;;  %s734_s22 = scalar_lea.hbm (!%p118_p9), %s782_s2, %s375_s14 }
  0x11   : > { %s297_s16 = sshll.u32 (!%p118_p9), %s139_s8, 4  ;;  %s740_s13 = scalar_lea.sflag (!%p118_p9), [#allocation3], %s137_s5  ;;  %s736_s16 = int_to_ptr.vmem [resolvable:$true] %s297_s16 }
  0x12   : > { %s494_s23 = scalar_lea.vmem (!%p118_p9), %s736_s16, 1024  ;;  %s557_s24 = smov (!%p118_p9), [#allocation2]  }
  0x13   : > { %v187_v0 = vld [vmem:[%s781_s1 + $0xf8] sm:$0xff]  ;;  %v186_v2 = vld [vmem:[%s781_s1 + $0xf0] sm:$0xff]  ;;  %v185_v4 = vld [vmem:[%s781_s1 + $0xe8] sm:$0xff]  ;;  %s790_s6 = smov (!%p141_p10, %s364_s6), 7  ;;  %vm273_vm0 = vcmask 523264   ;;  %v556_v40 = vmov 0.0   ;;  %p495_p11 = scmp.ne.s32.totalorder %s736_s16, %s494_s23 }
  0x14   : > { %v171_v1 = vld [vmem:[%s781_s1 + $0x78] sm:$0xff]  ;;  %376 = vmatprep.subr.mxu0 %v187_v0  ;;  %420 = vmatprep.subr.mxu1 %v187_v0  ;;  %v170_v3 = vld [vmem:[%s781_s1 + $0x70] sm:$0xff]  ;;  %v169_v5 = vld [vmem:[%s781_s1 + $0x68] sm:$0xff]  ;;  %s373_s17 = sshll.u32 %s790_s6, 4  ;;  %274 = vst.msk [vmem:[%s139_s8] sm:$0xff] %vm273_vm0, %v556_v40  ;;  %s498_s25 = sshll.u32 %s557_s24, 4  ;;  %s499_s25 = int_to_ptr.vmem [resolvable:$false] %s498_s25 }
  0x15   : > { %377 = vmatpush3.msra.mxu0 %v171_v1  ;;  %436 = vmatpush3.msra.mxu1 %v171_v1  ;;  %v184_v6 = vld [vmem:[%s781_s1 + $0xe0] sm:$0xff]  ;;  %v183_v8 = vld [vmem:[%s781_s1 + $0xd8] sm:$0xff]  ;;  %v182_v10 = vld [vmem:[%s781_s1 + $0xd0] sm:$0xff]  ;;  %s145_s28 = scalar_lea.vmem %s780_s0, %s373_s17  ;;  %275 = vst.msk [vmem:[%s139_s8 + $0x20] sm:$0xff] %vm273_vm0, %v556_v40  ;;  %p496_p12 = pnand %p495_p11, %p613_p5 }
  0x16   : > { %378 = vmatprep.subr.mxu0 %v186_v2  ;;  %421 = vmatprep.subr.mxu1 %v186_v2  ;;  %v168_v7 = vld [vmem:[%s781_s1 + $0x60] sm:$0xff]  ;;  %v167_v9 = vld [vmem:[%s781_s1 + $0x58] sm:$0xff]  ;;  %v166_v11 = vld [vmem:[%s781_s1 + $0x50] sm:$0xff]  ;;  %276 = vst.msk [vmem:[%s139_s8 + $0x18] sm:$0xff] %vm273_vm0, %v556_v40  ;;  %s500_s26 = scalar_lea.vmem %s499_s25, 2048  ;;  %p501_p0 = scmp.lt.s32.totalorder %s736_s16, %s499_s25 }
  0x17   : > { %379 = vmatpush3.msra.mxu0 %v170_v3  ;;  %437 = vmatpush3.msra.mxu1 %v170_v3  ;;  %v181_v12 = vld [vmem:[%s781_s1 + $0xc8] sm:$0xff]  ;;  %v180_v14 = vld [vmem:[%s781_s1 + $0xc0] sm:$0xff]  ;;  %v179_v16 = vld [vmem:[%s781_s1 + $0xb8] sm:$0xff]  ;;  %277 = vst.msk [vmem:[%s139_s8 + $0x38] sm:$0xff] %vm273_vm0, %v556_v40  ;;  %p497_p13 = pneg %p496_p12  ;;  %p502_p1 = scmp.lt.s32.totalorder %s500_s26, %s494_s23 }
  0x18   : > { %380 = vmatprep.subr.mxu0 %v185_v4  ;;  %422 = vmatprep.subr.mxu1 %v185_v4  ;;  %v165_v13 = vld [vmem:[%s781_s1 + $0x48] sm:$0xff]  ;;  %v164_v15 = vld [vmem:[%s781_s1 + $0x40] sm:$0xff]  ;;  %v163_v17 = vld [vmem:[%s781_s1 + $0x38] sm:$0xff] }
  0x19   : > { %381 = vmatpush3.msra.mxu0 %v169_v5  ;;  %438 = vmatpush3.msra.mxu1 %v169_v5  ;;  %v178_v18 = vld [vmem:[%s781_s1 + $0xb0] sm:$0xff]  ;;  %v177_v20 = vld [vmem:[%s781_s1 + $0xa8] sm:$0xff]  ;;  %v176_v22 = vld [vmem:[%s781_s1 + $0xa0] sm:$0xff]  ;;  %p503_p2 = por %p502_p1, %p501_p0 }
  0x1a   : > { %382 = vmatprep.subr.mxu0 %v184_v6  ;;  %423 = vmatprep.subr.mxu1 %v184_v6  ;;  %v162_v19 = vld [vmem:[%s781_s1 + $0x30] sm:$0xff]  ;;  %v161_v21 = vld [vmem:[%s781_s1 + $0x28] sm:$0xff]  ;;  %v160_v23 = vld [vmem:[%s781_s1 + $0x20] sm:$0xff] }
  0x1b   : > { %383 = vmatpush3.msra.mxu0 %v168_v7  ;;  %439 = vmatpush3.msra.mxu1 %v168_v7  ;;  %v175_v24 = vld [vmem:[%s781_s1 + $0x98] sm:$0xff]  ;;  %v174_v26 = vld [vmem:[%s781_s1 + $0x90] sm:$0xff]  ;;  %v173_v28 = vld [vmem:[%s781_s1 + $0x88] sm:$0xff]  ;;  %p504_p3 = pnand %p503_p2, %p497_p13 }
  0x1c   : > { %384 = vmatprep.subr.mxu0 %v183_v8  ;;  %424 = vmatprep.subr.mxu1 %v183_v8  ;;  %v159_v25 = vld [vmem:[%s781_s1 + $0x18] sm:$0xff]  ;;  %v158_v27 = vld [vmem:[%s781_s1 + $0x10] sm:$0xff]  ;;  %v157_v29 = vld [vmem:[%s781_s1 + $0x8] sm:$0xff] }
  0x1d   : > { %385 = vmatpush3.msra.mxu0 %v167_v9  ;;  %440 = vmatpush3.msra.mxu1 %v167_v9  ;;  %v172_v30 = vld [vmem:[%s781_s1 + $0x80] sm:$0xff]  ;;  %v149_v32 = vld [vmem:[%s145_s28 + $0x8] sm:$0xff]  ;;  %v151_v36 = vld [vmem:[%s145_s28 + $0x18] sm:$0xff] }
  0x1e   : > { %386 = vmatprep.subr.mxu0 %v182_v10  ;;  %425 = vmatprep.subr.mxu1 %v182_v10  ;;  %v156_v31 = vld [vmem:[%s781_s1] sm:$0xff]  ;;  %v153_v33 = vld [vmem:[%s145_s28 + $0x28] sm:$0xff]  ;;  %v155_v37 = vld [vmem:[%s145_s28 + $0x38] sm:$0xff] }
  0x1f   : > { %387 = vmatpush3.msra.mxu0 %v166_v11  ;;  %441 = vmatpush3.msra.mxu1 %v166_v11  ;;  %v148_v34 = vld [vmem:[%s145_s28] sm:$0xff]  ;;  %v150_v38 = vld [vmem:[%s145_s28 + $0x10] sm:$0xff] }
  0x20   : > { %388 = vmatprep.subr.mxu0 %v181_v12  ;;  %426 = vmatprep.subr.mxu1 %v181_v12  ;;  %v152_v35 = vld [vmem:[%s145_s28 + $0x20] sm:$0xff]  ;;  %v154_v39 = vld [vmem:[%s145_s28 + $0x30] sm:$0xff] }
  0x21   : > { %389 = vmatpush3.msra.mxu0 %v165_v13  ;;  %442 = vmatpush3.msra.mxu1 %v165_v13 }
  0x22   : > { %390 = vmatprep.subr.mxu0 %v180_v14  ;;  %427 = vmatprep.subr.mxu1 %v180_v14 }
  0x23   : > { %391 = vmatpush3.msra.mxu0 %v164_v15  ;;  %443 = vmatpush3.msra.mxu1 %v164_v15 }
  0x24   : > { %392 = vmatprep.subr.mxu0 %v179_v16  ;;  %428 = vmatprep.subr.mxu1 %v179_v16 }
  0x25   : > { %393 = vmatpush3.msra.mxu0 %v163_v17  ;;  %444 = vmatpush3.msra.mxu1 %v163_v17 }
  0x26   : > { %394 = vmatprep.subr.mxu0 %v178_v18  ;;  %429 = vmatprep.subr.mxu1 %v178_v18 }
  0x27   : > { %395 = vmatpush3.msra.mxu0 %v162_v19  ;;  %445 = vmatpush3.msra.mxu1 %v162_v19 }
  0x28   : > { %396 = vmatprep.subr.mxu0 %v177_v20  ;;  %430 = vmatprep.subr.mxu1 %v177_v20 }
  0x29   : > { %397 = vmatpush3.msra.mxu0 %v161_v21  ;;  %446 = vmatpush3.msra.mxu1 %v161_v21 }
  0x2a   : > { %398 = vmatprep.subr.mxu0 %v176_v22  ;;  %431 = vmatprep.subr.mxu1 %v176_v22 }
  0x2b   : > { %399 = vmatpush3.msra.mxu0 %v160_v23  ;;  %447 = vmatpush3.msra.mxu1 %v160_v23 }
  0x2c   : > { %400 = vmatprep.subr.mxu0 %v175_v24  ;;  %432 = vmatprep.subr.mxu1 %v175_v24 }
  0x2d   : > { %401 = vmatpush3.msra.mxu0 %v159_v25  ;;  %448 = vmatpush3.msra.mxu1 %v159_v25 }
  0x2e   : > { %402 = vmatprep.subr.mxu0 %v174_v26  ;;  %433 = vmatprep.subr.mxu1 %v174_v26 }
  0x2f   : > { %403 = vmatpush3.msra.mxu0 %v158_v27  ;;  %449 = vmatpush3.msra.mxu1 %v158_v27 }
  0x30   : > { %404 = vmatprep.subr.mxu0 %v173_v28  ;;  %434 = vmatprep.subr.mxu1 %v173_v28 }
  0x31   : > { %405 = vmatpush3.msra.mxu0 %v157_v29  ;;  %450 = vmatpush3.msra.mxu1 %v157_v29 }
  0x32   : > { %406 = vmatprep.subr.mxu0 %v172_v30  ;;  %435 = vmatprep.subr.mxu1 %v172_v30 }
  0x33   : > { %407 = vmatpush3.msra.mxu0 %v156_v31  ;;  %451 = vmatpush3.msra.mxu1 %v156_v31 }
  0x34   : > { %252 = vmatprep.mubr.f32.mxu0 %v149_v32  ;;  %262 = vmatprep.mubr.f32.mxu1 %v153_v33 }
  0x35   : > { %253 = vmatmul.mubr.f32.vlgmr.msra.gmra.mxu0 %v148_v34  ;;  %263 = vmatmul.mubr.f32.vlgmr.msra.gmra.mxu1 %v152_v35 }
  0x36   : > { %257 = vmatprep.mubr.f32.mxu0 %v151_v36  ;;  %267 = vmatprep.mubr.f32.mxu1 %v155_v37 }
  0x39   : > { %258 = vmatmul.mubr.f32.gmra.mxu0 %v150_v38  ;;  %268 = vmatmul.mubr.f32.gmra.mxu1 %v154_v39 }
  0xf5   : > { %v408_v41 = vpop.f32.mrf.mxu0  ;;  %v414_v42 = vpop.f32.mrf.mxu1 }
  0xf7   : > { %v409_v43 = vpop.f32.mrf.mxu0  ;;  %v415_v44 = vpop.f32.mrf.mxu1 }
  0xf8   : > { %v410_v45 = vadd.f32 %v409_v43, %v408_v41  ;;  %v416_v46 = vadd.f32 %v415_v44, %v414_v42 }
  0xf9   : > { %v411_v47 = vpop.f32.mrf.mxu0  ;;  %v417_v48 = vpop.f32.mrf.mxu1 }
  0xfa   : > { %278 = vst.msk [vmem:[%s139_s8 + $0x8] sm:$0xff] %vm273_vm0, %v410_v45  ;;  %280 = vst.msk [vmem:[%s139_s8 + $0x28] sm:$0xff] %vm273_vm0, %v416_v46 }
  0xfb   : > { %v412_v49 = vpop.f32.mrf.mxu0  ;;  %v418_v50 = vpop.f32.mrf.mxu1 }
  0xfc   : > { %v413_v51 = vadd.f32 %v412_v49, %v411_v47  ;;  %v419_v52 = vadd.f32 %v418_v50, %v417_v48 }
  0xfe   : > { %279 = vst.msk [vmem:[%s139_s8 + $0x10] sm:$0xff] %vm273_vm0, %v413_v51  ;;  %281 = vst.msk [vmem:[%s139_s8 + $0x30] sm:$0xff] %vm273_vm0, %v419_v52 }
  0xff   : > { %507 = shalt.err (!%p504_p3)
}
 0x100   : > { %s508_s27 = scalar_lea.hbm %s734_s22, 1024  ;;  %s512_s29 = scalar_lea.hbm %s782_s2, 2048 }
 0x101   : > { %p509_p4 = scmp.ne.s32.totalorder %s734_s22, %s508_s27  ;;  %p513_p9 = scmp.lt.s32.totalorder %s734_s22, %s782_s2 }
 0x102   : > { %p514_p10 = scmp.lt.s32.totalorder %s512_s29, %s508_s27 }
 0x103   : > { %p510_p7 = pnand %p509_p4, %p613_p5 }
 0x104   : > { %p515_p11 = por %p514_p10, %p513_p9 }
 0x105   : > { %p511_p8 = pneg %p510_p7 }
 0x107   : > { %p516_p12 = pnand %p515_p11, %p511_p8 }
 0x109   : > { %519 = shalt.err (!%p516_p12)
}
 0x10a   : > { %s558_s4 = smov 128   ;;  %s559_s5 = smov 8  }
 0x10b   : > { %452 = dma.vmem_to_hbm [thread:$0]  (%p613_p5), %s736_s16, 1024, %s734_s22, %s740_s13, %s558_s4, %s558_s4, %s559_s5  }
 0x10c PF: > { %p458_p13 = scmp.ge.s32.totalorder %s554_s12, 2  ;;  %s312_s7 = sand.u32 1, %s542_s9  }
 0x10d   : > { %s313_s8 = scalar_lea.sflag [#allocation3], %s312_s7 }
 0x10e   : > { %p455_p0 = pnand %p458_p13, %p617_p6 }
 0x110   : > { %p456_p1 = pneg %p455_p0 }
 0x112   : > { %537 = dma.done.wait (%p456_p1), %s313_s8, 1024  }
 0x113   : > { %539 = vsyncadd (%p456_p1), %s313_s8, 4294966272  ;;  %p12_p2 = scmp.ge.s32.totalorder %s600_s15, 4   ;;  %s785_s9 = smov %s546_s10 }
 0x114   : > { %s786_s10 = smov %s550_s11  ;;  %s787_s11 = smov %s611_s18 }
 0x115   : > { %s788_s12 = smov %s600_s15  ;;  %14 = sbr.rel (!%p12_p2) target bundleno = 3 (0x3), region = 63 }
 0x11a   :  { %318 = vsyncpa [#allocation3], 1 }
 0x11b   :  { %320 = vsyncpa [#allocation3 + $0x1], 1 }

</bundles_post_ra>
